<compile_context>
chip_gen: v7x
topology: tpu7x:2x2x1
jax: 0.10.0
libtpu: 0.0.40
codegen_flags: <defaults>
</compile_context>

<pallas_src>
import functools
from typing import NamedTuple

import jax
import jax.numpy as jnp
from jax.experimental import pallas as pl
from jax.experimental.pallas import tpu as pltpu


def _round_up(x: int, m: int) -> int:
    return ((x + m - 1) // m) * m


def _pad2d(a, rows, cols):
    pr, pc = rows - a.shape[0], cols - a.shape[1]
    if pr == 0 and pc == 0:
        return a
    return jnp.pad(a, ((0, pr), (0, pc)))


def _tpu_vmem_bytes() -> int:
    """Physical VMEM per TensorCore; conservative 64 MiB fallback."""
    try:
        return int(pltpu.get_tpu_info().vmem_capacity_bytes)
    except Exception:
        return 64 * 1024 * 1024


class SMMLPWeights(NamedTuple):
    wgu_t: jax.Array          # (Hp, 2*Ip) fused [gate_j | up_j] blocks (width ti each)
    wd_t: jax.Array           # (Ip, Lp)   down_proj.weight.T, padded
    hidden_size: int
    intermediate_size: int
    last_size: int
    ti: int                   # intermediate-dim tile baked into wgu_t's layout


def prepare_smmlp_weights(gate_w, up_w, down_w, *, ti=None,
                          compute_dtype=jnp.bfloat16):
    """One-time weight preparation (keep out of the per-call hot path).

    gate_w/up_w: (I, H) in PyTorch nn.Linear layout. down_w: (L, I).
    Transposes to [in, out], casts to the compute dtype, zero-pads every dim to
    lane-/tile-aligned sizes and interleaves gate/up in ti-wide column blocks so
    the kernel streams a single fused weight. Zero padding is mathematically
    inert: padded H rows/cols contribute 0, padded I columns give
    silu(0) * 0 = 0, padded L/M are sliced off after the kernel.
    """
    I, H = gate_w.shape
    L, I2 = down_w.shape
    assert I == I2 and up_w.shape == (I, H)

    Hp = _round_up(H, 128)
    Lp = _round_up(L, 128)
    Ip_min = _round_up(I, 128)
    wbytes = jnp.dtype(compute_dtype).itemsize
    vmem = _tpu_vmem_bytes()

    if ti is None:
        # Resident fast path: all weights fit comfortably in VMEM -> a single
        # j step, weight blocks never change, so they are DMA'd once and
        # reused across every row tile (decode / small layers).
        resident_bytes = (Hp * 2 * Ip_min + Ip_min * Lp) * wbytes
        if resident_bytes <= int(0.40 * vmem):
            ti = Ip_min
        else:
            # Streamed path: bigger ti on 128 MiB chips (v5e/v6e) to amortize
            # the per-step accumulator RMW and pipeline overhead; 512 on v7x.
            ti = 1024 if vmem >= 100 * 1024 * 1024 else 512
    assert ti % 128 == 0, "ti must be a multiple of 128 (lane width)"
    ti = min(ti, Ip_min)
    Ip = _round_up(I, ti)
    n_j = Ip // ti

    wg = _pad2d(gate_w.T.astype(compute_dtype), Hp, Ip)
    wu = _pad2d(up_w.T.astype(compute_dtype), Hp, Ip)
    wgu = jnp.concatenate(
        [wg.reshape(Hp, n_j, ti), wu.reshape(Hp, n_j, ti)], axis=2
    ).reshape(Hp, 2 * Ip)
    wd = _pad2d(down_w.T.astype(compute_dtype), Ip, Lp)
    return SMMLPWeights(wgu, wd, H, I, L, ti)


def _smmlp_kernel(x_ref, wgu_ref, wd_ref, o_ref, acc_ref, *, ti):
    # x_ref  : (tm, Hp)      wgu_ref: (Hp, 2*ti)  [gate_j | up_j]
    # wd_ref : (ti, Lp)      o_ref  : (tm, Lp)
    # acc_ref: VMEM (tm, Lp) f32 accumulator, resident across the j axis.
    j = pl.program_id(1)

    x = x_ref[...]
    gu = jnp.dot(x, wgu_ref[...], preferred_element_type=jnp.float32)
    gate = gu[:, :ti]                      # lane-aligned split (ti % 128 == 0)
    up = gu[:, ti:]
    hidden = (gate * jax.nn.sigmoid(gate)) * up          # SiLU(gate) * up
    contrib = jnp.dot(hidden.astype(wd_ref.dtype), wd_ref[...],
                      preferred_element_type=jnp.float32)

    @pl.when(j == 0)
    def _():                               # write-through: no zero-init store
        acc_ref[...] = contrib

    @pl.when(j != 0)
    def _():
        acc_ref[...] += contrib

    @pl.when(j == pl.num_programs(1) - 1)
    def _():
        o_ref[...] = acc_ref[...].astype(o_ref.dtype)


def _per_step_vmem_bytes(tm, Hp, Lp, ti, wbytes, out_bytes):
    return (2 * tm * Hp * wbytes           # x tile (double-buffered)
            + 2 * Hp * (2 * ti) * wbytes   # fused gate/up weight tile
            + 2 * ti * Lp * wbytes         # down-proj weight tile
            + 2 * tm * Lp * out_bytes      # output tile
            + tm * Lp * 4)                 # f32 accumulator scratch


def smmlp_forward(x, weights: SMMLPWeights, *, tm=None):
    """x: (..., hidden_size). Returns (..., last_size) in x.dtype."""
    wgu_t, wd_t, H, _I, L, ti = weights
    assert x.shape[-1] == H
    lead = x.shape[:-1]
    x2d = x.reshape(-1, H)
    M = x2d.shape[0]

    compute_dtype = wgu_t.dtype
    wbytes = jnp.dtype(compute_dtype).itemsize
    out_dtype = x.dtype
    out_bytes = jnp.dtype(out_dtype).itemsize
    Hp = wgu_t.shape[0]
    Ip, Lp = wd_t.shape
    n_j = Ip // ti

    vmem = _tpu_vmem_bytes()
    big_vmem = vmem >= 100 * 1024 * 1024           # 128 MiB (v5e/v6e) vs 64 MiB (v7x)
    vmem_limit = int(min(0.85 * vmem, 120 * 1024 * 1024))

    m_al = _round_up(M, 8)
    if tm is None:
        tm = 512 if big_vmem else 384              # arithmetic-intensity target
    tm = min(_round_up(tm, 8), m_al)
    # v7x has 2 TensorCores: keep >= 2 row tiles so both get "parallel" work.
    if (not big_vmem) and tm >= m_al and m_al >= 256:
        tm = _round_up((m_al + 1) // 2, 8)
    # Shrink the row tile until the per-step working set fits the VMEM budget.
    budget = int(0.9 * vmem_limit)
    while tm > 8 and _per_step_vmem_bytes(tm, Hp, Lp, ti, wbytes, out_bytes) > budget:
        tm = max(8, _round_up(tm // 2, 8))

    Mp = _round_up(M, tm)
    if M == Mp and H == Hp and x2d.dtype == compute_dtype:
        xp = x2d                                   # no extra HBM pass
    else:
        xp = _pad2d(x2d.astype(compute_dtype), Mp, Hp)

    out_p = pl.pallas_call(
        functools.partial(_smmlp_kernel, ti=ti),
        out_shape=jax.ShapeDtypeStruct((Mp, Lp), out_dtype),
        grid_spec=pltpu.PrefetchScalarGridSpec(
            num_scalar_prefetch=0,
            grid=(Mp // tm, n_j),
            in_specs=[
                pl.BlockSpec((tm, Hp), lambda i, j: (i, 0)),       # x rows
                pl.BlockSpec((Hp, 2 * ti), lambda i, j: (0, j)),   # fused gate|up
                pl.BlockSpec((ti, Lp), lambda i, j: (j, 0)),       # down_proj.T
            ],
            out_specs=pl.BlockSpec((tm, Lp), lambda i, j: (i, 0)),
            scratch_shapes=[pltpu.VMEM((tm, Lp), jnp.float32)],
        ),
        compiler_params=pltpu.CompilerParams(
            dimension_semantics=("parallel", "arbitrary"),
            vmem_limit_bytes=vmem_limit,
        ),
    )(xp, wgu_t, wd_t)

    out = out_p if (Mp == M and Lp == L) else out_p[:M, :L]
    return out.reshape(*lead, L)


def smmlp_reference(x2d, gate_w, up_w, down_w):
    gate = x2d @ gate_w.T
    up = x2d @ up_w.T
    return (jax.nn.silu(gate) * up) @ down_w.T


if __name__ == "__main__":
    # Module config: hidden_size=32, intermediate_size=64, last_size defaults
    # to hidden_size. Input: batch=2, seq=8.
    hidden_size = 32
    intermediate_size = 64
    last_size = hidden_size
    batch, seq = 2, 8

    key = jax.random.PRNGKey(0)
    kx, kg, ku, kd = jax.random.split(key, 4)

    x = jax.random.normal(kx, (batch, seq, hidden_size), dtype=jnp.float32)
    # Deterministic init, PyTorch layout [out_features, in_features].
    gate_w = jax.random.normal(kg, (intermediate_size, hidden_size),
                               dtype=jnp.float32) * (hidden_size ** -0.5)
    up_w = jax.random.normal(ku, (intermediate_size, hidden_size),
                             dtype=jnp.float32) * (hidden_size ** -0.5)
    down_w = jax.random.normal(kd, (last_size, intermediate_size),
                               dtype=jnp.float32) * (intermediate_size ** -0.5)

    x2d = x.reshape(batch * seq, hidden_size)
    ref = smmlp_reference(x2d, gate_w, up_w, down_w)

    # f32 compute path: tight correctness check vs. the reference.
    w_f32 = prepare_smmlp_weights(gate_w, up_w, down_w,
                                  compute_dtype=jnp.float32)
    out_f32 = jax.block_until_ready(smmlp_forward(x, w_f32))
    assert out_f32.shape == (batch, seq, last_size)
    assert jnp.allclose(out_f32.reshape(-1, last_size), ref,
                        atol=1e-5, rtol=1e-5), "f32 mismatch vs reference"

    # bf16 compute path (the performance default): looser tolerance.
    w_bf16 = prepare_smmlp_weights(gate_w, up_w, down_w)   # bf16 by default
    out_bf16 = jax.block_until_ready(smmlp_forward(x, w_bf16))
    assert out_bf16.shape == (batch, seq, last_size)
    assert jnp.allclose(out_bf16.reshape(-1, last_size), ref,
                        atol=5e-2, rtol=5e-2), "bf16 mismatch vs reference"

    print("KERNEL_OK")
</pallas_src>

<mosaic_0001>
module attributes {stable_mosaic.version = 11 : i64} {
  func.func @_smmlp_kernel(%arg0: i32, %arg1: i32, %arg2: memref<16x128xf32, #tpu.memory_space<vmem>>, %arg3: memref<128x256xf32, #tpu.memory_space<vmem>>, %arg4: memref<128x128xf32, #tpu.memory_space<vmem>>, %arg5: memref<16x128xf32, #tpu.memory_space<vmem>>, %arg6: memref<16x128xf32, #tpu.memory_space<vmem>>) attributes {dimension_semantics = [#tpu.dimension_semantics<parallel>, #tpu.dimension_semantics<arbitrary>], iteration_bounds = array<i64: 1, 1>, scalar_prefetch = 0 : i64, scratch_operands = 1 : i64, tpu.core_type = #tpu.core_type<tc>, window_params = [{transform_indices = @transform_0, window_bounds = array<i64: 16, 128>}, {transform_indices = @transform_1, window_bounds = array<i64: 128, 256>}, {transform_indices = @transform_2, window_bounds = array<i64: 128, 128>}, {transform_indices = @transform_3, window_bounds = array<i64: 16, 128>}]} {
    %c0 = arith.constant 0 : index
    %c0_0 = arith.constant 0 : index
    %0 = vector.load %arg2[%c0, %c0_0] : memref<16x128xf32, #tpu.memory_space<vmem>>, vector<16x128xf32>
    %c0_1 = arith.constant 0 : index
    %c0_2 = arith.constant 0 : index
    %1 = vector.load %arg3[%c0_1, %c0_2] : memref<128x256xf32, #tpu.memory_space<vmem>>, vector<128x256xf32>
    %cst = arith.constant dense<0.000000e+00> : vector<16x256xf32>
    %2 = tpu.matmul %0, %1, %cst {dimension_numbers = #tpu.dot_dimension_numbers<[1], [0], [0], [1], [0, 0, 1, 1], [], []>} : vector<16x128xf32>, vector<128x256xf32>, vector<16x256xf32> -> vector<16x256xf32>
    %3 = vector.extract_strided_slice %2 {offsets = [0, 0], sizes = [16, 128], strides = [1, 1]} : vector<16x256xf32> to vector<16x128xf32>
    %4 = vector.extract_strided_slice %2 {offsets = [0, 128], sizes = [16, 128], strides = [1, 1]} : vector<16x256xf32> to vector<16x128xf32>
    %5 = arith.negf %3 : vector<16x128xf32>
    %6 = math.exp %5 : vector<16x128xf32>
    %cst_3 = arith.constant 1.000000e+00 : f32
    %7 = vector.broadcast %cst_3 : f32 to vector<16x128xf32>
    %8 = arith.addf %7, %6 : vector<16x128xf32>
    %9 = arith.divf %7, %8 : vector<16x128xf32>
    %10 = arith.mulf %3, %9 : vector<16x128xf32>
    %11 = arith.mulf %10, %4 : vector<16x128xf32>
    %c0_4 = arith.constant 0 : index
    %c0_5 = arith.constant 0 : index
    %12 = vector.load %arg4[%c0_4, %c0_5] : memref<128x128xf32, #tpu.memory_space<vmem>>, vector<128x128xf32>
    %cst_6 = arith.constant dense<0.000000e+00> : vector<16x128xf32>
    %13 = tpu.matmul %11, %12, %cst_6 {dimension_numbers = #tpu.dot_dimension_numbers<[1], [0], [0], [1], [0, 0, 1, 1], [], []>} : vector<16x128xf32>, vector<128x128xf32>, vector<16x128xf32> -> vector<16x128xf32>
    %c0_i32 = arith.constant 0 : i32
    %14 = arith.cmpi eq, %arg1, %c0_i32 : i32
    %15 = arith.extui %14 : i1 to i32
    %c0_i32_7 = arith.constant 0 : i32
    %16 = arith.cmpi ne, %15, %c0_i32_7 : i32
    scf.if %16 {
      %c0_12 = arith.constant 0 : index
      %c0_13 = arith.constant 0 : index
      %23 = vector.load %arg6[%c0_12, %c0_13] : memref<16x128xf32, #tpu.memory_space<vmem>>, vector<16x128xf32>
      tpu.vector_store %arg6[%c0_12, %c0_13], %13 {strides = array<i32>} : memref<16x128xf32, #tpu.memory_space<vmem>>, vector<16x128xf32>,
    } else {
    }
    %c0_i32_8 = arith.constant 0 : i32
    %17 = arith.cmpi ne, %arg1, %c0_i32_8 : i32
    %18 = arith.extui %17 : i1 to i32
    %c0_i32_9 = arith.constant 0 : i32
    %19 = arith.cmpi ne, %18, %c0_i32_9 : i32
    scf.if %19 {
      %c0_12 = arith.constant 0 : index
      %c0_13 = arith.constant 0 : index
      %23 = vector.load %arg6[%c0_12, %c0_13] : memref<16x128xf32, #tpu.memory_space<vmem>>, vector<16x128xf32>
      %24 = arith.addf %23, %13 : vector<16x128xf32>
      %c0_14 = arith.constant 0 : index
      %c0_15 = arith.constant 0 : index
      %25 = vector.load %arg6[%c0_14, %c0_15] : memref<16x128xf32, #tpu.memory_space<vmem>>, vector<16x128xf32>
      tpu.vector_store %arg6[%c0_14, %c0_15], %24 {strides = array<i32>} : memref<16x128xf32, #tpu.memory_space<vmem>>, vector<16x128xf32>,
    } else {
    }
    %c0_i32_10 = arith.constant 0 : i32
    %20 = arith.cmpi eq, %arg1, %c0_i32_10 : i32
    %21 = arith.extui %20 : i1 to i32
    %c0_i32_11 = arith.constant 0 : i32
    %22 = arith.cmpi ne, %21, %c0_i32_11 : i32
    scf.if %22 {
      %c0_12 = arith.constant 0 : index
      %c0_13 = arith.constant 0 : index
      %23 = vector.load %arg6[%c0_12, %c0_13] : memref<16x128xf32, #tpu.memory_space<vmem>>, vector<16x128xf32>
      %c0_14 = arith.constant 0 : index
      %c0_15 = arith.constant 0 : index
      %24 = vector.load %arg5[%c0_14, %c0_15] : memref<16x128xf32, #tpu.memory_space<vmem>>, vector<16x128xf32>
      tpu.vector_store %arg5[%c0_14, %c0_15], %23 {strides = array<i32>} : memref<16x128xf32, #tpu.memory_space<vmem>>, vector<16x128xf32>,
    } else {
    }
    return
  }
  func.func @transform_0(%arg0: i32, %arg1: i32) -> (i32, i32) {
    %c0_i32 = arith.constant 0 : i32
    %c0_i32_0 = arith.constant 0 : i32
    return %arg0, %c0_i32 : i32, i32
  }
  func.func @transform_1(%arg0: i32, %arg1: i32) -> (i32, i32) {
    %c0_i32 = arith.constant 0 : i32
    %c0_i32_0 = arith.constant 0 : i32
    return %c0_i32, %arg1 : i32, i32
  }
  func.func @transform_2(%arg0: i32, %arg1: i32) -> (i32, i32) {
    %c0_i32 = arith.constant 0 : i32
    %c0_i32_0 = arith.constant 0 : i32
    return %arg1, %c0_i32 : i32, i32
  }
  func.func @transform_3(%arg0: i32, %arg1: i32) -> (i32, i32) {
    %c0_i32 = arith.constant 0 : i32
    %c0_i32_0 = arith.constant 0 : i32
    return %arg0, %c0_i32 : i32, i32
  }
}

</mosaic_0001>

<bundles_post_ra>
// kernel: tpu_custom_call.1
= control target key start
LH: loop header
LB: loop body
LE: loop exit
PB: predicated region body
PF: predicated region fallthrough
CT: control target
= control target key end

     0   :  { %8 = vsyncpa [#allocation4], 0  ;;  %s633_s0 = inlined_call_operand.hbm [shape: f32[16,128], index: 0, kind: input, shape index: {}]   ;;  %s634_s1 = inlined_call_operand.hbm [shape: f32[128,256], index: 1, kind: input, shape index: {}]   ;;  %s635_s2 = inlined_call_operand.hbm [shape: f32[128,128], index: 2, kind: input, shape index: {}]   ;;  %s636_s3 = inlined_call_operand.hbm [shape: f32[16,128], index: 3, kind: output, shape index: {}]  }
   0x1   :  { %9 = vsyncpa [#allocation7], 0 }
   0x2   :  { %10 = vsyncpa [#allocation5], 0  ;;  %s545_s12 = smov [#allocation6]   ;;  %s451_s16 = scalar_lea.hbm %s634_s1, 4096 }
   0x3   :  { %s28_s13 = sshll.u32 %s545_s12, 4  ;;  %p452_p0 = scmp.ne.s32.totalorder %s634_s1, %s451_s16  ;;  %s29_s13 = int_to_ptr.vmem [resolvable:$true] %s28_s13 }
   0x4   :  { %p455_p1 = scmp.lt.u32.totalorder %s451_s16, %s634_s1 }
   0x6   :  { %p457_p2 = pnand %p455_p1, %p452_p0 }
   0x8   :  { %460 = shalt.err (!%p457_p2)
}
   0x9   :  { %s461_s21 = scalar_lea.vmem %s29_s13, 4096  ;;  %p466_p4 = scmp.lt.s32.totalorder %s29_s13, %s29_s13 }
   0xa   :  { %p462_p3 = scmp.ne.s32.totalorder %s29_s13, %s461_s21  ;;  %p467_p5 = scmp.lt.s32.totalorder %s461_s21, %s461_s21 }
   0xc   :  { %p468_p6 = por %p467_p5, %p466_p4 }
   0xe   :  { %p469_p7 = pnand %p468_p6, %p462_p3 }
  0x10   :  { %472 = shalt.err (!%p469_p7)
}
  0x11   :  { %s546_s22 = smov 256   ;;  %s547_s23 = smov 16  }
  0x12   :  { %34 = dma.hbm_to_vmem [thread:$0]  %s634_s1, 4096, %s29_s13, [#allocation7], %s546_s22, %s546_s22, %s547_s23  }
  0x13   :  { %s548_s26 = smov [#allocation3]   ;;  %s473_s30 = scalar_lea.hbm %s633_s0, 256 }
  0x14   :  { %s16_s27 = sshll.u32 %s548_s26, 4  ;;  %p474_p8 = scmp.ne.s32.totalorder %s633_s0, %s473_s30  ;;  %s17_s27 = int_to_ptr.vmem [resolvable:$true] %s16_s27 }
  0x15   :  { %p477_p9 = scmp.lt.u32.totalorder %s473_s30, %s633_s0 }
  0x17   :  { %p479_p10 = pnand %p477_p9, %p474_p8 }
  0x19   :  { %482 = shalt.err (!%p479_p10)
}
  0x1a   :  { %s483_s8 = scalar_lea.vmem %s17_s27, 256  ;;  %p488_p12 = scmp.lt.s32.totalorder %s17_s27, %s17_s27 }
  0x1b   :  { %p484_p11 = scmp.ne.s32.totalorder %s17_s27, %s483_s8  ;;  %p489_p13 = scmp.lt.s32.totalorder %s483_s8, %s483_s8 }
  0x1d   :  { %p490_p0 = por %p489_p13, %p488_p12 }
  0x1f   :  { %p491_p1 = pnand %p490_p0, %p484_p11 }
  0x21   :  { %494 = shalt.err (!%p491_p1)
}
  0x22   :  { %s549_s1 = smov 128   ;;  %s550_s9 = smov 8  }
  0x23   :  { %22 = dma.hbm_to_vmem [thread:$0]  %s633_s0, 256, %s17_s27, [#allocation4], %s549_s1, %s549_s1, %s550_s9  }
  0x24   :  { %s551_s12 = smov [#allocation8]   ;;  %s495_s16 = scalar_lea.hbm %s635_s2, 2048 }
  0x25   :  { %s40_s13 = sshll.u32 %s551_s12, 4  ;;  %p496_p2 = scmp.ne.s32.totalorder %s635_s2, %s495_s16  ;;  %s41_s13 = int_to_ptr.vmem [resolvable:$true] %s40_s13 }
  0x26   :  { %p499_p3 = scmp.lt.u32.totalorder %s495_s16, %s635_s2 }
  0x28   :  { %p501_p4 = pnand %p499_p3, %p496_p2 }
  0x2a   :  { %504 = shalt.err (!%p501_p4)
}
  0x2b   :  { %s505_s21 = scalar_lea.vmem %s41_s13, 2048  ;;  %p510_p6 = scmp.lt.s32.totalorder %s41_s13, %s41_s13 }
  0x2c   :  { %p506_p5 = scmp.ne.s32.totalorder %s41_s13, %s505_s21  ;;  %p511_p7 = scmp.lt.s32.totalorder %s505_s21, %s505_s21 }
  0x2e   :  { %p512_p8 = por %p511_p7, %p510_p6 }
  0x30   :  { %p513_p9 = pnand %p512_p8, %p506_p5 }
  0x32   :  { %516 = shalt.err (!%p513_p9)
}
  0x33   :  { %46 = dma.hbm_to_vmem [thread:$0]  %s635_s2, 2048, %s41_s13, [#allocation7], %s549_s1, %s549_s1, %s550_s9  }
  0x34   :  { %539 = dma.done.wait [#allocation4], 256  }
  0x35   :  { %540 = vsyncadd [#allocation4], 4294967040 }
  0x36   :  { %541 = dma.done.wait [#allocation7], 6144  }
  0x37   :  { %542 = vsyncadd [#allocation7], 4294961152  ;;  %v552_v0 = vmov 0.0   ;;  %v59_v1 = vld [vmem:[#allocation6 + $0x8] sm:$0xff]  ;;  %v61_v2 = vld [vmem:[#allocation6 + $0x18] sm:$0xff]  ;;  %s553_s2 = smov [#allocation9]  }
  0x38   :  { %154 = vmatprep.mubr.f32.mxu0 %v552_v0  ;;  %v58_v3 = vld [vmem:[#allocation6] sm:$0xff]  ;;  %v370_v4 = vpack.c.bf16 %v61_v2, %v59_v1  ;;  %v60_v5 = vld [vmem:[#allocation6 + $0x10] sm:$0xff]  ;;  %v63_v6 = vld [vmem:[#allocation6 + $0x28] sm:$0xff]  ;;  %s302_s23 = sshll.u32 %s553_s2, 4  ;;  %s303_s23 = int_to_ptr.vmem [resolvable:$true] %s302_s23 }
  0x39   :  { %v65_v7 = vld [vmem:[#allocation6 + $0x38] sm:$0xff]  ;;  %v372_v8 = vpack.c.bf16 %v60_v5, %v58_v3  ;;  %v62_v10 = vld [vmem:[#allocation6 + $0x20] sm:$0xff]  ;;  %v64_v11 = vld [vmem:[#allocation6 + $0x30] sm:$0xff]  ;;  %s517_s24 = scalar_lea.vmem %s303_s23, 256  ;;  %p522_p11 = scmp.lt.s32.totalorder %s303_s23, %s303_s23 }
  0x3a   :  { %v374_v9 = vpack.c.bf16 %v65_v7, %v63_v6  ;;  %v67_v12 = vld [vmem:[#allocation6 + $0x48] sm:$0xff]  ;;  %371 = vmatprep.subr.bf16.mxu0 %v370_v4  ;;  %v69_v13 = vld [vmem:[#allocation6 + $0x58] sm:$0xff]  ;;  %v376_v14 = vpack.c.bf16 %v64_v11, %v62_v10  ;;  %v66_v16 = vld [vmem:[#allocation6 + $0x40] sm:$0xff]  ;;  %p518_p10 = scmp.ne.s32.totalorder %s303_s23, %s517_s24  ;;  %p523_p12 = scmp.lt.s32.totalorder %s517_s24, %s517_s24 }
  0x3b   :  { %373 = vmatpush1.bf16.msra.mxu0 %v372_v8  ;;  %v378_v15 = vpack.c.bf16 %v69_v13, %v67_v12  ;;  %v68_v17 = vld [vmem:[#allocation6 + $0x50] sm:$0xff]  ;;  %v71_v18 = vld [vmem:[#allocation6 + $0x68] sm:$0xff]  ;;  %v73_v19 = vld [vmem:[#allocation6 + $0x78] sm:$0xff] }
  0x3c   :  { %375 = vmatprep.subr.bf16.mxu0 %v374_v9  ;;  %v380_v20 = vpack.c.bf16 %v68_v17, %v66_v16  ;;  %v382_v21 = vpack.c.bf16 %v73_v19, %v71_v18  ;;  %v70_v22 = vld [vmem:[#allocation6 + $0x60] sm:$0xff]  ;;  %v72_v23 = vld [vmem:[#allocation6 + $0x70] sm:$0xff]  ;;  %v75_v24 = vld [vmem:[#allocation6 + $0x88] sm:$0xff]  ;;  %p524_p13 = por %p523_p12, %p522_p11 }
  0x3d   :  { %v77_v25 = vld [vmem:[#allocation6 + $0x98] sm:$0xff]  ;;  %v384_v26 = vpack.c.bf16 %v72_v23, %v70_v22  ;;  %v74_v28 = vld [vmem:[#allocation6 + $0x80] sm:$0xff]  ;;  %v76_v29 = vld [vmem:[#allocation6 + $0x90] sm:$0xff] }
  0x3e   :  { %v386_v27 = vpack.c.bf16 %v77_v25, %v75_v24  ;;  %v79_v30 = vld [vmem:[#allocation6 + $0xa8] sm:$0xff]  ;;  %v81_v31 = vld [vmem:[#allocation6 + $0xb8] sm:$0xff]  ;;  %v388_v32 = vpack.c.bf16 %v76_v29, %v74_v28  ;;  %v78_v34 = vld [vmem:[#allocation6 + $0xa0] sm:$0xff]  ;;  %p525_p0 = pnand %p524_p13, %p518_p10 }
  0x3f   :  { %377 = vmatpush1.bf16.msra.mxu0 %v376_v14  ;;  %v390_v33 = vpack.c.bf16 %v81_v31, %v79_v30  ;;  %v80_v35 = vld [vmem:[#allocation6 + $0xb0] sm:$0xff]  ;;  %v83_v36 = vld [vmem:[#allocation6 + $0xc8] sm:$0xff]  ;;  %v85_v37 = vld [vmem:[#allocation6 + $0xd8] sm:$0xff] }
  0x40   :  { %379 = vmatprep.subr.bf16.mxu0 %v378_v15  ;;  %v392_v38 = vpack.c.bf16 %v80_v35, %v78_v34  ;;  %v394_v39 = vpack.c.bf16 %v85_v37, %v83_v36  ;;  %v82_v40 = vld [vmem:[#allocation6 + $0xc0] sm:$0xff]  ;;  %v84_v41 = vld [vmem:[#allocation6 + $0xd0] sm:$0xff]  ;;  %v87_v42 = vld [vmem:[#allocation6 + $0xe8] sm:$0xff] }
  0x41   :  { %v89_v43 = vld [vmem:[#allocation6 + $0xf8] sm:$0xff]  ;;  %v396_v44 = vpack.c.bf16 %v84_v41, %v82_v40  ;;  %v86_v46 = vld [vmem:[#allocation6 + $0xe0] sm:$0xff]  ;;  %v88_v47 = vld [vmem:[#allocation6 + $0xf0] sm:$0xff] }
  0x42   :  { %v398_v45 = vpack.c.bf16 %v89_v43, %v87_v42  ;;  %v400_v48 = vpack.c.bf16 %v88_v47, %v86_v46  ;;  %v56_v49 = vld [vmem:[#allocation3] sm:$0xff]  ;;  %v57_v50 = vld [vmem:[#allocation3 + $0x8] sm:$0xff]  ;;  %v183_v51 = vld [vmem:[#allocation8] sm:$0xff] }
  0x43   :  { %381 = vmatpush1.bf16.msra.mxu0 %v380_v20  ;;  %v184_v52 = vld [vmem:[#allocation8 + $0x8] sm:$0xff]  ;;  %v185_v54 = vld [vmem:[#allocation8 + $0x10] sm:$0xff]  ;;  %v186_v55 = vld [vmem:[#allocation8 + $0x18] sm:$0xff] }
  0x44   :  { %383 = vmatprep.subr.bf16.mxu0 %v382_v21  ;;  %v402_v53 = vpack.c.bf16 %v184_v52, %v183_v51  ;;  %v406_v56 = vpack.c.bf16 %v186_v55, %v185_v54  ;;  %v187_v57 = vld [vmem:[#allocation8 + $0x20] sm:$0xff]  ;;  %v188_v58 = vld [vmem:[#allocation8 + $0x28] sm:$0xff]  ;;  %v189_v60 = vld [vmem:[#allocation8 + $0x30] sm:$0xff] }
  0x45   :  { %v410_v59 = vpack.c.bf16 %v188_v58, %v187_v57  ;;  %v190_v61 = vld [vmem:[#allocation8 + $0x38] sm:$0xff]  ;;  %v191_v63 = vld [vmem:[#allocation8 + $0x40] sm:$0xff]  ;;  %v193_v2 = vld [vmem:[#allocation8 + $0x50] sm:$0xff] }
  0x46   :  { %403 = vmatprep.subr.bf16.mxu1 %v402_v53  ;;  %v414_v62 = vpack.c.bf16 %v190_v61, %v189_v60  ;;  %v194_v3 = vld [vmem:[#allocation8 + $0x58] sm:$0xff]  ;;  %v195_v5 = vld [vmem:[#allocation8 + $0x60] sm:$0xff]  ;;  %v196_v6 = vld [vmem:[#allocation8 + $0x68] sm:$0xff] }
  0x47   :  { %385 = vmatpush1.bf16.msra.mxu0 %v384_v26  ;;  %405 = vmatpush3.bf16.msra.mxu1 %v402_v53  ;;  %v422_v4 = vpack.c.bf16 %v194_v3, %v193_v2  ;;  %v426_v7 = vpack.c.bf16 %v196_v6, %v195_v5  ;;  %v197_v8 = vld [vmem:[#allocation8 + $0x70] sm:$0xff]  ;;  %v198_v9 = vld [vmem:[#allocation8 + $0x78] sm:$0xff] }
  0x48   :  { %387 = vmatprep.subr.bf16.mxu0 %v386_v27  ;;  %407 = vmatprep.subr.bf16.mxu1 %v406_v56  ;;  %v430_v10 = vpack.c.bf16 %v198_v9, %v197_v8 }
  0x4b   :  { %389 = vmatpush1.bf16.msra.mxu0 %v388_v32  ;;  %409 = vmatpush3.bf16.msra.mxu1 %v406_v56 }
  0x4c   :  { %391 = vmatprep.subr.bf16.mxu0 %v390_v33  ;;  %411 = vmatprep.subr.bf16.mxu1 %v410_v59 }
  0x4f   :  { %393 = vmatpush1.bf16.msra.mxu0 %v392_v38  ;;  %413 = vmatpush3.bf16.msra.mxu1 %v410_v59 }
  0x50   :  { %395 = vmatprep.subr.bf16.mxu0 %v394_v39  ;;  %415 = vmatprep.subr.bf16.mxu1 %v414_v62 }
  0x53   :  { %397 = vmatpush1.bf16.msra.mxu0 %v396_v44  ;;  %417 = vmatpush3.bf16.msra.mxu1 %v414_v62 }
  0x54   :  { %399 = vmatprep.subr.bf16.mxu0 %v398_v45 }
  0x57   :  { %401 = vmatpush1.bf16.msra.mxu0 %v400_v48 }
  0x5a   :  { %155 = vmatmul.mubr.f32.vlgmr.msra.gmra.mrb[0].mxu0 %v56_v49 }
  0x5b   :  { %160 = vmatprep.mubr.f32.mxu0 %v552_v0  ;;  %v192_v0 = vld [vmem:[#allocation8 + $0x48] sm:$0xff] }
  0x5c   :  { %v418_v1 = vpack.c.bf16 %v192_v0, %v191_v63 }
  0x5e   :  { %161 = vmatmul.mubr.f32.gmra.mrb[2].mxu0 %v57_v50  ;;  %419 = vmatprep.subr.bf16.mxu1 %v418_v1 }
  0x5f   :  { %421 = vmatpush3.bf16.msra.mxu1 %v418_v1 }
  0x60   :  { %423 = vmatprep.subr.bf16.mxu1 %v422_v4 }
  0x63   :  { %425 = vmatpush3.bf16.msra.mxu1 %v422_v4 }
  0x64   :  { %427 = vmatprep.subr.bf16.mxu1 %v426_v7 }
  0x67   :  { %429 = vmatpush3.bf16.msra.mxu1 %v426_v7 }
  0x68   :  { %431 = vmatprep.subr.bf16.mxu1 %v430_v10 }
  0x6b   :  { %433 = vmatpush3.bf16.msra.mxu1 %v430_v10 }
 0x12d   :  { %v156_v11 = vpop.f32.mrb[0].mxu0 }
 0x12e   :  { %v315_v12 = vmul.f32 -1.442695, %v156_v11  ;;  %v158_v13 = vpop.f32.mrb[1].mxu0 }
 0x130   :  { %443 = vpow2.f32 %v315_v12 }
 0x131   :  { %v162_v14 = vpop.f32.mrb[2].mxu0 }
 0x132   :  { %v316_v15 = vmul.f32 -1.442695, %v162_v14  ;;  %v164_v16 = vpop.f32.mrb[3].mxu0 }
 0x134   :  { %445 = vpow2.f32 %v316_v15 }
 0x13a   :  { %v444_v17 = vpop.eup %443 }
 0x13b   :  { %v173_v18 = vadd.f32 1.0, %v444_v17 }
 0x13d   :  { %447 = vrcp.f32 %v173_v18 }
 0x13e   :  { %v446_v19 = vpop.eup %445 }
 0x13f   :  { %v174_v20 = vadd.f32 1.0, %v446_v19 }
 0x141   :  { %449 = vrcp.f32 %v174_v20 }
 0x147   :  { %v448_v21 = vpop.eup %447 }
 0x148   :  { %v179_v22 = vmul.f32 %v448_v21, %v156_v11 }
 0x14a   :  { %v181_v23 = vmul.f32 %v179_v22, %v158_v13 }
 0x14b   :  { %v450_v24 = vpop.eup %449 }
 0x14c   :  { %v180_v25 = vmul.f32 %v450_v24, %v162_v14  ;;  %367 = vmatprep.mubr.f32.mxu1 %v181_v23 }
 0x14e   :  { %v182_v26 = vmul.f32 %v180_v25, %v164_v16 }
 0x150   :  { %368 = vmatmul.mubr.f32.vlgmr.msra.gmra.mrb[0].mxu1 %v182_v26 }
 0x223   :  { %v369_v27 = vpop.f32.mrb[0].mxu1 }
 0x224   :  { %296 = vst [vmem:[#allocation9 + $0x8] sm:$0xff] %v369_v27  ;;  %v265_v28 = vpop.f32.mrb[1].mxu1 }
 0x225   :  { %295 = vst [vmem:[#allocation9] sm:$0xff] %v265_v28 }
 0x226   :  { %528 = shalt.err (!%p525_p0)
}
 0x227   :  { %s529_s27 = scalar_lea.hbm %s636_s3, 256 }
 0x228   :  { %p530_p1 = scmp.ne.s32.totalorder %s636_s3, %s529_s27  ;;  %p533_p2 = scmp.lt.u32.totalorder %s529_s27, %s636_s3 }
 0x22a   :  { %p535_p3 = pnand %p533_p2, %p530_p1 }
 0x22c   :  { %538 = shalt.err (!%p535_p3)
}
 0x22d   :  { %308 = dma.vmem_to_hbm [thread:$0]  %s303_s23, 256, %s636_s3, [#allocation5], %s549_s1, %s549_s1, %s550_s9  }
 0x22e   :  { %543 = dma.done.wait [#allocation5], 256  }
 0x22f   :  { %544 = vsyncadd [#allocation5], 4294967040 }
 0x230   :  { %312 = vsyncpa [#allocation4], 1 }
 0x231   :  { %313 = vsyncpa [#allocation7], 1 }
 0x232   :  { %314 = vsyncpa [#allocation5], 1 }

</bundles_post_ra>
